<compile_context>
chip_gen: v7x
topology: tpu7x:2x2x1
jax: 0.10.0
libtpu: 0.0.40
codegen_flags: <defaults>
</compile_context>

<pallas_src>
import numpy as np

import jax
import jax.numpy as jnp
from jax.experimental import pallas as pl
from jax.experimental.pallas import tpu as pltpu


K = 64           # embedding size (one_list.view(-1, 64) in the reference)
K_HALF = K // 2  # 32: width of each of the two linear branches
F_IN = 6         # [hour, minute, second, year, month, day]
PACK = 8         # block-diagonal packing factor p (rows fused per MXU row)
TILE_ROWS = 1024 # packed rows per grid step (= PACK * TILE_ROWS original rows)


def _round_up(x, m):
    return ((x + m - 1) // m) * m


def _d2v_kernel(x_ref, w_ref, b_ref, m_ref, o_ref):
    # x: (T, 6p), w: (6p, 64p) block-diagonal, b/m: (1, 64p), o: (T, 64p)
    y = jnp.dot(
        x_ref[...],
        w_ref[...],
        precision=jax.lax.Precision.HIGHEST,
        preferred_element_type=jnp.float32,
    )
    y = y + b_ref[...]
    # Within every 64-wide block, cols 0:32 are the identity branch and
    # cols 32:64 are the sin branch; m_ref is the precomputed 0/1 mask.
    o_ref[...] = jnp.where(m_ref[...] != 0.0, jnp.sin(y), y)


def d2v_encode_pallas(feats_2d_np, w_wide, b_wide, sin_mask,
                      *, pack=PACK, tile_rows=TILE_ROWS):
    """feats_2d_np: (N, 6) float32 numpy -> (N, 64) float32 embedding."""
    n = int(feats_2d_np.shape[0])
    kin = F_IN * pack
    kout = K * pack

    rows_packed = pl.cdiv(n, pack)
    tile = min(tile_rows, _round_up(rows_packed, 8))
    np_pad = _round_up(rows_packed, tile)      # packed rows, grid-divisible
    n_pad = np_pad * pack                      # original rows after padding

    feats_pad = np.zeros((n_pad, F_IN), dtype=np.float32)
    feats_pad[:n] = feats_2d_np
    # Free row-major view: p consecutive rows become one packed row of 6p feats.
    x_packed = jnp.asarray(feats_pad.reshape(np_pad, kin))

    grid = (np_pad // tile,)

    out = pl.pallas_call(
        _d2v_kernel,
        out_shape=jax.ShapeDtypeStruct((np_pad, kout), jnp.float32),
        grid_spec=pltpu.PrefetchScalarGridSpec(
            num_scalar_prefetch=0,
            grid=grid,
            in_specs=[
                pl.BlockSpec((tile, kin), lambda i: (i, 0)),   # packed rows
                pl.BlockSpec((kin, kout), lambda i: (0, 0)),   # weights (resident)
                pl.BlockSpec((1, kout), lambda i: (0, 0)),     # bias
                pl.BlockSpec((1, kout), lambda i: (0, 0)),     # sin mask
            ],
            out_specs=pl.BlockSpec((tile, kout), lambda i: (i, 0)),
        ),
        compiler_params=pltpu.CompilerParams(
            dimension_semantics=("parallel",),        # megacore on v7x
            vmem_limit_bytes=32 * 1024 * 1024,        # safe on 64 MiB v7x VMEM
        ),
        cost_estimate=pl.CostEstimate(
            flops=2 * n_pad * F_IN * K,
            transcendentals=n_pad * K,
            bytes_accessed=n_pad * (F_IN + K) * 4 + kin * kout * 4,
        ),
    )(x_packed, w_wide, b_wide, sin_mask)

    # Free view back to per-row 64-wide embeddings; drop padding rows.
    return out.reshape(n_pad, K)[:n]


def timestamps_to_features(time_seq_np):
    """Vectorized (B, S) unix timestamps -> (B, S, 6) float features.

    Fields are [hour, minute, second, year, month, day], matching the
    PyTorch forward.
    """
    # TODO(synk): the original PyTorch uses local-timezone
    # datetime.fromtimestamp; we decompose in UTC (numpy datetime64) so the
    # result is deterministic across hosts/TZ settings.
    ts = np.asarray(time_seq_np, dtype=np.int64)
    dt_s = ts.astype("datetime64[s]")
    dt_m = dt_s.astype("datetime64[m]")
    dt_h = dt_s.astype("datetime64[h]")
    dt_d = dt_s.astype("datetime64[D]")
    dt_mo = dt_s.astype("datetime64[M]")
    dt_y = dt_s.astype("datetime64[Y]")

    hour = (dt_h - dt_d).astype(np.int64)
    minute = (dt_m - dt_h).astype(np.int64)
    second = (dt_s - dt_m).astype(np.int64)
    year = dt_y.astype(np.int64) + 1970
    month = (dt_mo - dt_y).astype(np.int64) + 1
    day = (dt_d - dt_mo).astype(np.int64) + 1

    feats = np.stack([hour, minute, second, year, month, day], axis=-1)
    return feats.astype(np.float32)


class Date2vecPallas:
    """Synthetic, deterministically-initialized Date2Vec encoder."""

    def __init__(self, key, pack=PACK):
        self.pack = pack
        k1, k2, k3, k4 = jax.random.split(key, 4)
        # fc1: Linear(6, 32), fc2: Linear(6, 32)  (weights stored as (in, out))
        scale = 1.0 / np.sqrt(F_IN)
        w1 = jax.random.uniform(k1, (F_IN, K_HALF), jnp.float32, -scale, scale)
        w2 = jax.random.uniform(k2, (F_IN, K_HALF), jnp.float32, -scale, scale)
        b1 = jax.random.uniform(k3, (K_HALF,), jnp.float32, -scale, scale)
        b2 = jax.random.uniform(k4, (K_HALF,), jnp.float32, -scale, scale)
        self.w_cat = jnp.concatenate([w1, w2], axis=1)            # (6, 64)
        self.b_cat = jnp.concatenate([b1, b2])[None, :]           # (1, 64)

        # Block-diagonal packed weights: (6p, 64p); bias/mask tiled to (1, 64p).
        eye = jnp.eye(pack, dtype=jnp.float32)
        self.w_wide = jnp.kron(eye, self.w_cat)                   # (6p, 64p)
        self.b_wide = jnp.tile(self.b_cat, (1, pack))             # (1, 64p)
        base_mask = jnp.concatenate(
            [jnp.zeros((K_HALF,), jnp.float32), jnp.ones((K_HALF,), jnp.float32)])
        self.sin_mask = jnp.tile(base_mask, (pack,))[None, :]     # (1, 64p)

    def __call__(self, time_seq_np):
        # time_seq_np: (B, S) unix timestamps (numpy)
        feats = timestamps_to_features(time_seq_np)               # (B, S, 6)
        b, s, _ = feats.shape
        emb = d2v_encode_pallas(
            feats.reshape(b * s, F_IN),
            self.w_wide, self.b_wide, self.sin_mask, pack=self.pack)
        return emb.reshape(b, s, K)

    def reference(self, time_seq_np):
        """Plain-JAX reference for correctness checking."""
        feats = jnp.asarray(timestamps_to_features(time_seq_np))
        y = jnp.einsum("bsf,fk->bsk", feats, self.w_cat,
                       precision="highest") + self.b_cat[None]
        out1 = y[..., :K_HALF]
        out2 = jnp.sin(y[..., K_HALF:])
        return jnp.concatenate([out1, out2], axis=-1)


if __name__ == "__main__":
    key = jax.random.PRNGKey(0)
    k_ts, k_model = jax.random.split(key)

    batch, seq = 2, 8
    # Deterministic unix timestamps in [2000-01-01, ~2021) range.
    time_seq = np.asarray(
        jax.random.randint(k_ts, (batch, seq), 946684800, 1609459200),
        dtype=np.int64,
    )

    model = Date2vecPallas(k_model)
    out = model(time_seq)                   # (2, 8, 64)
    out = jax.block_until_ready(out)

    ref = model.reference(time_seq)
    # f32 matmul (year ~2020 scale) + sin of O(800) arguments: compare with
    # f32-appropriate tolerance.
    np.testing.assert_allclose(np.asarray(out), np.asarray(ref),
                               rtol=1e-3, atol=2e-3)
    assert out.shape == (batch, seq, K)

    print("KERNEL_OK")
</pallas_src>

<mosaic_0001>
module attributes {stable_mosaic.version = 11 : i64} {
  func.func @_d2v_kernel(%arg0: i32, %arg1: memref<8x48xf32, #tpu.memory_space<vmem>>, %arg2: memref<48x512xf32, #tpu.memory_space<vmem>>, %arg3: memref<1x512xf32, #tpu.memory_space<vmem>>, %arg4: memref<1x512xf32, #tpu.memory_space<vmem>>, %arg5: memref<8x512xf32, #tpu.memory_space<vmem>>) attributes {dimension_semantics = [#tpu.dimension_semantics<parallel>], iteration_bounds = array<i64: 1>, scalar_prefetch = 0 : i64, scratch_operands = 0 : i64, tpu.core_type = #tpu.core_type<tc>, window_params = [{transform_indices = @transform_0, window_bounds = array<i64: 8, 48>}, {pipeline_mode = #tpu.pipeline_mode<synchronous>, transform_indices = @transform_1, window_bounds = array<i64: 48, 512>}, {pipeline_mode = #tpu.pipeline_mode<synchronous>, transform_indices = @transform_2, window_bounds = array<i64: 1, 512>}, {pipeline_mode = #tpu.pipeline_mode<synchronous>, transform_indices = @transform_3, window_bounds = array<i64: 1, 512>}, {transform_indices = @transform_4, window_bounds = array<i64: 8, 512>}]} {
    %c0 = arith.constant 0 : index
    %c0_0 = arith.constant 0 : index
    %0 = vector.load %arg1[%c0, %c0_0] : memref<8x48xf32, #tpu.memory_space<vmem>>, vector<8x48xf32>
    %c0_1 = arith.constant 0 : index
    %c0_2 = arith.constant 0 : index
    %1 = vector.load %arg2[%c0_1, %c0_2] : memref<48x512xf32, #tpu.memory_space<vmem>>, vector<48x512xf32>
    %cst = arith.constant dense<0.000000e+00> : vector<8x512xf32>
    %2 = tpu.matmul %0, %1, %cst {dimension_numbers = #tpu.dot_dimension_numbers<[1], [0], [0], [1], [0, 0, 1, 1], [], []>, precision = #tpu.contract_precision<fp32>} : vector<8x48xf32>, vector<48x512xf32>, vector<8x512xf32> -> vector<8x512xf32>
    %c0_3 = arith.constant 0 : index
    %c0_4 = arith.constant 0 : index
    %3 = vector.load %arg3[%c0_3, %c0_4] : memref<1x512xf32, #tpu.memory_space<vmem>>, vector<1x512xf32>
    %4 = vector.broadcast %3 : vector<1x512xf32> to vector<8x512xf32>
    %5 = arith.addf %2, %4 : vector<8x512xf32>
    %c0_5 = arith.constant 0 : index
    %c0_6 = arith.constant 0 : index
    %6 = vector.load %arg4[%c0_5, %c0_6] : memref<1x512xf32, #tpu.memory_space<vmem>>, vector<1x512xf32>
    %cst_7 = arith.constant 0.000000e+00 : f32
    %7 = vector.broadcast %cst_7 : f32 to vector<1x512xf32>
    %8 = arith.cmpf one, %6, %7 : vector<1x512xf32>
    %9 = math.sin %5 : vector<8x512xf32>
    %10 = vector.shape_cast %8 : vector<1x512xi1> to vector<1x512xi1>
    %11 = vector.broadcast %10 : vector<1x512xi1> to vector<8x512xi1>
    %12 = arith.select %11, %9, %5 : vector<8x512xi1>, vector<8x512xf32>
    %c0_8 = arith.constant 0 : index
    %c0_9 = arith.constant 0 : index
    %13 = vector.load %arg5[%c0_8, %c0_9] : memref<8x512xf32, #tpu.memory_space<vmem>>, vector<8x512xf32>
    tpu.vector_store %arg5[%c0_8, %c0_9], %12 {strides = array<i32>} : memref<8x512xf32, #tpu.memory_space<vmem>>, vector<8x512xf32>,
    return
  }
  func.func @transform_0(%arg0: i32) -> (i32, i32) {
    %c0_i32 = arith.constant 0 : i32
    %c0_i32_0 = arith.constant 0 : i32
    return %arg0, %c0_i32 : i32, i32
  }
  func.func @transform_1(%arg0: i32) -> (i32, i32) {
    %c0_i32 = arith.constant 0 : i32
    %c0_i32_0 = arith.constant 0 : i32
    %c0_i32_1 = arith.constant 0 : i32
    return %c0_i32, %c0_i32_0 : i32, i32
  }
  func.func @transform_2(%arg0: i32) -> (i32, i32) {
    %c0_i32 = arith.constant 0 : i32
    %c0_i32_0 = arith.constant 0 : i32
    %c0_i32_1 = arith.constant 0 : i32
    return %c0_i32, %c0_i32_0 : i32, i32
  }
  func.func @transform_3(%arg0: i32) -> (i32, i32) {
    %c0_i32 = arith.constant 0 : i32
    %c0_i32_0 = arith.constant 0 : i32
    %c0_i32_1 = arith.constant 0 : i32
    return %c0_i32, %c0_i32_0 : i32, i32
  }
  func.func @transform_4(%arg0: i32) -> (i32, i32) {
    %c0_i32 = arith.constant 0 : i32
    %c0_i32_0 = arith.constant 0 : i32
    return %arg0, %c0_i32 : i32, i32
  }
}

</mosaic_0001>

<bundles_post_ra>
// kernel: tpu_custom_call.1
= control target key start
LH: loop header
LB: loop body
LE: loop exit
PB: predicated region body
PF: predicated region fallthrough
CT: control target
= control target key end

     0   :  { %9 = vsyncpa [#allocation3], 0  ;;  %s2796_s0 = inlined_call_operand.hbm [shape: f32[8,48], index: 0, kind: input, shape index: {}]   ;;  %s2797_s1 = inlined_call_operand.hbm [shape: f32[48,512], index: 1, kind: input, shape index: {}]   ;;  %s2798_s2 = inlined_call_operand.vmem [shape: f32[1,512], index: 2, kind: input, shape index: {}]   ;;  %s2799_s3 = inlined_call_operand.vmem [shape: f32[1,512], index: 3, kind: input, shape index: {}]   ;;  %s2800_s4 = inlined_call_operand.hbm [shape: f32[8,512], index: 4, kind: output, shape index: {}]  }
   0x1   :  { %10 = vsyncpa [#allocation6], 0 }
   0x2   :  { %11 = vsyncpa [#allocation4], 0  ;;  %s2049_s15 = smov [#allocation2]   ;;  %s2050_s17 = smov [#allocation5]  }
   0x3   :  { %s18_s16 = sshll.u32 %s2049_s15, 4  ;;  %s27_s18 = sshll.u32 %s2050_s17, 4  ;;  %s19_s16 = int_to_ptr.vmem [resolvable:$true] %s18_s16  ;;  %s2087_s18 = int_to_ptr.vmem [resolvable:$true] %s27_s18 }
   0x4   :  { %s1977_s21 = scalar_lea.hbm %s2796_s0, 128 }
   0x5   :  { %p1978_p0 = scmp.ne.s32.totalorder %s2796_s0, %s1977_s21  ;;  %p1981_p1 = scmp.lt.u32.totalorder %s1977_s21, %s2796_s0 }
   0x7   :  { %p1983_p2 = pnand %p1981_p1, %p1978_p0 }
   0x9   :  { %1986 = shalt.err (!%p1983_p2)
}
   0xa   :  { %s1987_s26 = scalar_lea.vmem %s19_s16, 128  ;;  %p1992_p4 = scmp.lt.s32.totalorder %s19_s16, %s19_s16 }
   0xb   :  { %p1988_p3 = scmp.ne.s32.totalorder %s19_s16, %s1987_s26  ;;  %p1993_p5 = scmp.lt.s32.totalorder %s1987_s26, %s1987_s26 }
   0xd   :  { %p1994_p6 = por %p1993_p5, %p1992_p4 }
   0xf   :  { %p1995_p7 = pnand %p1994_p6, %p1988_p3 }
  0x11   :  { %1998 = shalt.err (!%p1995_p7)
}
  0x12   :  { %21 = dma.hbm_to_vmem [thread:$0]  %s2796_s0, 128, %s19_s16, [#allocation3]  }
  0x13   :  { %s1999_s5 = scalar_lea.hbm %s2797_s1, 3072 }
  0x14   :  { %p2000_p8 = scmp.ne.s32.totalorder %s2797_s1, %s1999_s5  ;;  %p2003_p9 = scmp.lt.u32.totalorder %s1999_s5, %s2797_s1 }
  0x16   :  { %p2005_p10 = pnand %p2003_p9, %p2000_p8 }
  0x18   :  { %2008 = shalt.err (!%p2005_p10)
}
  0x19   :  { %s2009_s10 = scalar_lea.vmem %s2087_s18, 3072  ;;  %p2014_p12 = scmp.lt.s32.totalorder %s2087_s18, %s2087_s18 }
  0x1a   :  { %p2010_p11 = scmp.ne.s32.totalorder %s2087_s18, %s2009_s10  ;;  %p2015_p13 = scmp.lt.s32.totalorder %s2009_s10, %s2009_s10 }
  0x1c   :  { %p2016_p0 = por %p2015_p13, %p2014_p12 }
  0x1e   :  { %p2017_p1 = pnand %p2016_p0, %p2010_p11 }
  0x20   :  { %2020 = shalt.err (!%p2017_p1)
}
  0x21   :  { %s2051_s0 = smov 512   ;;  %s2052_s11 = smov 32  }
  0x22   :  { %33 = dma.hbm_to_vmem [thread:$0]  %s2797_s1, 3072, %s2087_s18, [#allocation6], %s2051_s0, %s2051_s0, %s2052_s11  }
  0x23   :  { %2043 = dma.done.wait [#allocation3], 128  }
  0x24   :  { %2044 = vsyncadd [#allocation3], 4294967168 }
  0x25   :  { %2045 = dma.done.wait [#allocation6], 3072  }
  0x26   :  { %2046 = vsyncadd [#allocation6], 4294964224  ;;  %v2053_v0 = vmov 0.0   ;;  %v46_v1 = vld [vmem:[#allocation5 + $0x8] sm:$0xff]  ;;  %v48_v3 = vld [vmem:[#allocation5 + $0x18] sm:$0xff]  ;;  %vm91_vm0 = vcmask 392192  }
  0x27   :  { %171 = vmatprep.mubr.f32.mxu0 %v2053_v0  ;;  %766 = vmatprep.mubr.f32.mxu1 %v2053_v0  ;;  %v50_v2 = vld [vmem:[#allocation5 + $0x28] sm:$0xff]  ;;  %v95_v4 = vand.u32 4294901760, %v46_v1  ;;  %v52_v6 = vld [vmem:[#allocation5 + $0x38] sm:$0xff]  ;;  %v690_v7 = vand.u32 4294901760, %v48_v3  ;;  %v45_v8 = vld [vmem:[#allocation5] sm:$0xff] }
  0x28   :  { %v99_v5 = vand.u32 4294901760, %v50_v2  ;;  %v49_v9 = vld [vmem:[#allocation5 + $0x20] sm:$0xff]  ;;  %v694_v10 = vand.u32 4294901760, %v52_v6  ;;  %v97_v11 = vand.u32 4294901760, %v45_v8  ;;  %v47_v13 = vld [vmem:[#allocation5 + $0x10] sm:$0xff]  ;;  %v54_v15 = vld [vmem:[#allocation5 + $0x48] sm:$0xff] }
  0x29   :  { %v101_v12 = vand.u32 4294901760, %v49_v9  ;;  %v51_v14 = vld [vmem:[#allocation5 + $0x30] sm:$0xff]  ;;  %v2122_v17 = vsub.f32 %v46_v1, %v95_v4  ;;  %v2126_v19 = vsub.f32 %v48_v3, %v690_v7  ;;  %v58_v20 = vld [vmem:[#allocation5 + $0x68] sm:$0xff]  ;;  %v56_v21 = vld [vmem:[#allocation5 + $0x58] sm:$0xff]  ;;  %v692_v29 = vand.u32 4294901760, %v47_v13 }
  0x2a   :  { %v2120_v16 = vpack.c.bf16 %v99_v5, %v95_v4  ;;  %v2124_v18 = vsub.f32 %v50_v2, %v99_v5  ;;  %v60_v22 = vld [vmem:[#allocation5 + $0x78] sm:$0xff]  ;;  %v2128_v23 = vpack.c.bf16 %v694_v10, %v690_v7  ;;  %v2130_v24 = vsub.f32 %v52_v6, %v694_v10  ;;  %v53_v27 = vld [vmem:[#allocation5 + $0x40] sm:$0xff]  ;;  %v55_v37 = vld [vmem:[#allocation5 + $0x50] sm:$0xff] }
  0x2b   :  { %v2132_v25 = vpack.c.bf16 %v101_v12, %v97_v11  ;;  %v2134_v26 = vsub.f32 %v45_v8, %v97_v11  ;;  %v2137_v28 = vsub.f32 %v49_v9, %v101_v12  ;;  %v696_v30 = vand.u32 4294901760, %v51_v14  ;;  %v57_v32 = vld [vmem:[#allocation5 + $0x60] sm:$0xff]  ;;  %v59_v38 = vld [vmem:[#allocation5 + $0x70] sm:$0xff]  ;;  %v62_v43 = vld [vmem:[#allocation5 + $0x88] sm:$0xff] }
  0x2c   :  { %1765 = vmatprep.subr.bf16.mxu0 %v2120_v16  ;;  %v103_v31 = vand.u32 4294901760, %v54_v15  ;;  %1837 = vmatprep.subr.bf16.mxu1 %v2128_v23  ;;  %v107_v33 = vand.u32 4294901760, %v58_v20  ;;  %v698_v34 = vand.u32 4294901760, %v56_v21  ;;  %v702_v35 = vand.u32 4294901760, %v60_v22  ;;  %v66_v44 = vld [vmem:[#allocation5 + $0xa8] sm:$0xff]  ;;  %v64_v45 = vld [vmem:[#allocation5 + $0x98] sm:$0xff] }
  0x2d   :  { %1767 = vmatpush1.bf16.msra.mxu0 %v2132_v25  ;;  %v105_v36 = vand.u32 4294901760, %v53_v27  ;;  %v2141_v39 = vpack.c.bf16 %v696_v30, %v692_v29  ;;  %v2143_v40 = vsub.f32 %v47_v13, %v692_v29  ;;  %v2145_v41 = vsub.f32 %v51_v14, %v696_v30  ;;  %v68_v50 = vld [vmem:[#allocation5 + $0xb8] sm:$0xff]  ;;  %v61_v59 = vld [vmem:[#allocation5 + $0x80] sm:$0xff]  ;;  %v63_v2 = vld [vmem:[#allocation5 + $0x90] sm:$0xff] }
  0x2e   :  { %v2147_v42 = vsub.f32 %v54_v15, %v103_v31  ;;  %v2149_v46 = vpack.c.bf16 %v107_v33, %v103_v31  ;;  %v2151_v47 = vsub.f32 %v58_v20, %v107_v33  ;;  %v2153_v48 = vpack.c.bf16 %v702_v35, %v698_v34  ;;  %v65_v1 = vld [vmem:[#allocation5 + $0xa0] sm:$0xff]  ;;  %v67_v3 = vld [vmem:[#allocation5 + $0xb0] sm:$0xff]  ;;  %v44_v29 = vld [vmem:[#allocation2] sm:$0xff] }
  0x2f   :  { %v2155_v49 = vsub.f32 %v56_v21, %v698_v34  ;;  %1839 = vmatpush1.bf16.msra.mxu1 %v2141_v39  ;;  %v2158_v51 = vsub.f32 %v60_v22, %v702_v35  ;;  %v109_v52 = vand.u32 4294901760, %v57_v32  ;;  %v2160_v53 = vsub.f32 %v53_v27, %v105_v36 }
  0x30   :  { %v700_v54 = vand.u32 4294901760, %v55_v37  ;;  %1769 = vmatprep.subr.bf16.mxu0 %v2149_v46  ;;  %1841 = vmatprep.subr.bf16.mxu1 %v2153_v48  ;;  %v704_v55 = vand.u32 4294901760, %v59_v38  ;;  %v111_v56 = vand.u32 4294901760, %v62_v43  ;;  %v115_v57 = vand.u32 4294901760, %v66_v44 }
  0x31   :  { %v706_v58 = vand.u32 4294901760, %v64_v45  ;;  %v2164_v60 = vpack.c.bf16 %v109_v52, %v105_v36  ;;  %v2166_v61 = vsub.f32 %v57_v32, %v109_v52  ;;  %v710_v63 = vand.u32 4294901760, %v68_v50 }
  0x32   :  { %v2168_v62 = vsub.f32 %v55_v37, %v700_v54  ;;  %v2170_v4 = vpack.c.bf16 %v704_v55, %v700_v54  ;;  %v2172_v5 = vsub.f32 %v59_v38, %v704_v55  ;;  %v2174_v6 = vpack.c.bf16 %v115_v57, %v111_v56 }
  0x33   :  { %v2176_v7 = vsub.f32 %v62_v43, %v111_v56  ;;  %1771 = vmatpush1.bf16.msra.mxu0 %v2164_v60  ;;  %v2179_v8 = vsub.f32 %v66_v44, %v115_v57  ;;  %v2181_v9 = vpack.c.bf16 %v710_v63, %v706_v58  ;;  %v2183_v10 = vsub.f32 %v64_v45, %v706_v58 }
  0x34   :  { %v2185_v11 = vsub.f32 %v68_v50, %v710_v63  ;;  %1843 = vmatpush1.bf16.msra.mxu1 %v2170_v4  ;;  %1773 = vmatprep.subr.bf16.mxu0 %v2174_v6  ;;  %v113_v12 = vand.u32 4294901760, %v61_v59  ;;  %v117_v13 = vand.u32 4294901760, %v65_v1  ;;  %v708_v14 = vand.u32 4294901760, %v63_v2 }
  0x35   :  { %v712_v15 = vand.u32 4294901760, %v67_v3  ;;  %1845 = vmatprep.subr.bf16.mxu1 %v2181_v9  ;;  %v185_v20 = vand.u32 4294901760, %v2122_v17  ;;  %v197_v21 = vand.u32 4294901760, %v2124_v18  ;;  %v780_v22 = vand.u32 4294901760, %v2126_v19 }
  0x36   :  { %v792_v27 = vand.u32 4294901760, %v2130_v24  ;;  %v2194_v30 = vpack.c.bf16 %v117_v13, %v113_v12  ;;  %v2196_v31 = vsub.f32 %v61_v59, %v113_v12  ;;  %v2198_v32 = vsub.f32 %v65_v1, %v117_v13 }
  0x37   :  { %v2200_v33 = vpack.c.bf16 %v712_v15, %v708_v14  ;;  %v2202_v34 = vsub.f32 %v63_v2, %v708_v14  ;;  %v2204_v35 = vsub.f32 %v67_v3, %v712_v15  ;;  %v186_v36 = vsub.f32 %v2122_v17, %v185_v20 }
  0x38   :  { %v198_v37 = vsub.f32 %v2124_v18, %v197_v21  ;;  %1775 = vmatpush1.bf16.msra.mxu0 %v2194_v30  ;;  %v781_v38 = vsub.f32 %v2126_v19, %v780_v22  ;;  %v793_v43 = vsub.f32 %v2130_v24, %v792_v27  ;;  %v93_v44 = vsel %vm91_vm0, %v44_v29, 0 }
  0x39   :  { %1847 = vmatpush1.bf16.msra.mxu1 %v2200_v33  ;;  %v191_v45 = vand.u32 4294901760, %v2134_v26  ;;  %v187_v50 = vand.u32 4294901760, %v186_v36  ;;  %v2222_v54 = vand.u32 4294901760, %v93_v44  ;;  %v2804_v55 = vand.u32 4294901760, %v2137_v28 }
  0x3a   :  { %v199_v52 = vand.u32 4294901760, %v198_v37  ;;  %v782_v56 = vand.u32 4294901760, %v781_v38  ;;  %v794_v57 = vand.u32 4294901760, %v793_v43  ;;  %v2803_v59 = vand.u32 4294901760, %v2143_v40 }
  0x3b   :  { %v192_v58 = vsub.f32 %v2134_v26, %v191_v45  ;;  %v2230_v1 = vsub.f32 %v93_v44, %v2222_v54  ;;  %v204_v2 = vsub.f32 %v2137_v28, %v2804_v55  ;;  %v2802_v3 = vand.u32 4294901760, %v2145_v41 }
  0x3c   :  { %v1776_v63 = vpack.c.bf16 %v199_v52, %v187_v50  ;;  %v1848_v12 = vpack.c.bf16 %v794_v57, %v782_v56  ;;  %v787_v14 = vsub.f32 %v2143_v40, %v2803_v59  ;;  %v2801_v15 = vand.u32 4294901760, %v2147_v42 }
  0x3d   :  { %v193_v13 = vand.u32 4294901760, %v192_v58  ;;  %v2241_v29 = vand.u32 4294901760, %v2230_v1  ;;  %v205_v36 = vand.u32 4294901760, %v204_v2  ;;  %v799_v37 = vsub.f32 %v2145_v41, %v2802_v3 }
  0x3e   :  { %1777 = vmatprep.subr.bf16.mxu0 %v1776_v63  ;;  %v2805_v38 = vand.u32 4294901760, %v2151_v47  ;;  %1849 = vmatprep.subr.bf16.mxu1 %v1848_v12  ;;  %v788_v43 = vand.u32 4294901760, %v787_v14  ;;  %v210_v44 = vsub.f32 %v2147_v42, %v2801_v15  ;;  %v2806_v50 = vand.u32 4294901760, %v2155_v49 }
  0x3f   :  { %v2807_v52 = vand.u32 4294901760, %v2158_v51  ;;  %v175_v56 = vsub.f32 %v2230_v1, %v2241_v29  ;;  %v1778_v57 = vpack.c.bf16 %v205_v36, %v193_v13  ;;  %v800_v58 = vand.u32 4294901760, %v799_v37 }
  0x40   :  { %v222_v63 = vsub.f32 %v2151_v47, %v2805_v38  ;;  %v211_v2 = vand.u32 4294901760, %v210_v44  ;;  %v805_v12 = vsub.f32 %v2155_v49, %v2806_v50  ;;  %v215_v15 = vand.u32 4294901760, %v2160_v53 }
  0x41   :  { %v817_v14 = vsub.f32 %v2158_v51, %v2807_v52  ;;  %v176_v3 = vand.u32 4294901760, %v175_v56  ;;  %v1850_v59 = vpack.c.bf16 %v800_v58, %v788_v43  ;;  %v2812_v13 = vand.u32 4294901760, %v2166_v61 }
  0x42   :  { %v223_v55 = vand.u32 4294901760, %v222_v63  ;;  %v806_v36 = vand.u32 4294901760, %v805_v12  ;;  %v216_v44 = vsub.f32 %v2160_v53, %v215_v15  ;;  %v2810_v38 = vand.u32 4294901760, %v2168_v62 }
  0x43   :  { %v818_v37 = vand.u32 4294901760, %v817_v14  ;;  %177 = vmatmul.mubr.f32.vlgmr.msra.gmra.mrb[0].mxu0 %v176_v3  ;;  %772 = vmatmul.mubr.f32.vlgmr.msra.gmra.mrb[0].mxu1 %v176_v3  ;;  %v228_v52 = vsub.f32 %v2166_v61, %v2812_v13  ;;  %v2808_v43 = vand.u32 4294901760, %v2172_v5  ;;  %v2809_v56 = vand.u32 4294901760, %v2176_v7 }
  0x44   :  { %v1780_v50 = vpack.c.bf16 %v223_v55, %v211_v2  ;;  %1779 = vmatpush1.bf16.msra.mxu0 %v1778_v57  ;;  %1851 = vmatpush1.bf16.msra.mxu1 %v1850_v59  ;;  %v217_v63 = vand.u32 4294901760, %v216_v44  ;;  %v811_v12 = vsub.f32 %v2168_v62, %v2810_v38  ;;  %v2811_v14 = vand.u32 4294901760, %v2179_v8 }
  0x45   :  { %v1852_v58 = vpack.c.bf16 %v818_v37, %v806_v36  ;;  %v229_v55 = vand.u32 4294901760, %v228_v52  ;;  %v823_v3 = vsub.f32 %v2172_v5, %v2808_v43  ;;  %v234_v2 = vsub.f32 %v2176_v7, %v2809_v56  ;;  %307 = vmatprep.mubr.f32.mxu0 %v2053_v0  ;;  %902 = vmatprep.mubr.f32.mxu1 %v2053_v0 }
  0x46   :  { %1781 = vmatprep.subr.bf16.mxu0 %v1780_v50  ;;  %v2813_v59 = vand.u32 4294901760, %v2183_v10  ;;  %v812_v57 = vand.u32 4294901760, %v811_v12  ;;  %v246_v36 = vsub.f32 %v2179_v8, %v2811_v14  ;;  %v2814_v50 = vand.u32 4294901760, %v2185_v11 }
  0x47   :  { %1853 = vmatprep.subr.bf16.mxu1 %v1852_v58  ;;  %v2815_v52 = vand.u32 4294901760, %v2196_v31  ;;  %v1782_v37 = vpack.c.bf16 %v229_v55, %v217_v63  ;;  %v824_v44 = vand.u32 4294901760, %v823_v3  ;;  %v235_v43 = vand.u32 4294901760, %v234_v2 }
  0x48   :  { %v829_v56 = vsub.f32 %v2183_v10, %v2813_v59  ;;  %v247_v38 = vand.u32 4294901760, %v246_v36  ;;  %v841_v58 = vsub.f32 %v2185_v11, %v2814_v50  ;;  %v251_v14 = vand.u32 4294901760, %v2198_v32 }
  0x49   :  { %v240_v12 = vsub.f32 %v2196_v31, %v2815_v52  ;;  %1783 = vmatpush1.bf16.msra.mxu0 %v1782_v37  ;;  %v1854_v13 = vpack.c.bf16 %v824_v44, %v812_v57  ;;  %v2816_v55 = vand.u32 4294901760, %v2202_v34  ;;  %v846_v3 = vand.u32 4294901760, %v2204_v35 }
  0x4a   :  { %v830_v63 = vand.u32 4294901760, %v829_v56  ;;  %v1784_v2 = vpack.c.bf16 %v247_v38, %v235_v43  ;;  %v842_v59 = vand.u32 4294901760, %v841_v58  ;;  %v252_v50 = vsub.f32 %v2198_v32, %v251_v14 }
  0x4b   :  { %v241_v36 = vand.u32 4294901760, %v240_v12  ;;  %1855 = vmatpush1.bf16.msra.mxu1 %v1854_v13  ;;  %v835_v52 = vsub.f32 %v2202_v34, %v2816_v55  ;;  %v847_v56 = vsub.f32 %v2204_v35, %v846_v3  ;;  %v1788_v43 = vpack.c.bf16 %v2124_v18, %v2122_v17 }
  0x4c   :  { %1785 = vmatprep.subr.bf16.mxu0 %v1784_v2  ;;  %v1856_v57 = vpack.c.bf16 %v842_v59, %v830_v63  ;;  %v253_v37 = vand.u32 4294901760, %v252_v50  ;;  %v1860_v13 = vpack.c.bf16 %v2130_v24, %v2126_v19  ;;  %v1790_v55 = vpack.c.bf16 %v2137_v28, %v2134_v26 }
  0x4d   :  { %v836_v44 = vand.u32 4294901760, %v835_v52  ;;  %v848_v38 = vand.u32 4294901760, %v847_v56  ;;  %v1862_v59 = vpack.c.bf16 %v2145_v41, %v2143_v40  ;;  %v1792_v50 = vpack.c.bf16 %v2151_v47, %v2147_v42 }
  0x4e   :  { %1857 = vmatprep.subr.bf16.mxu1 %v1856_v57  ;;  %v1786_v58 = vpack.c.bf16 %v253_v37, %v241_v36  ;;  %v1864_v52 = vpack.c.bf16 %v2158_v51, %v2155_v49  ;;  %v1794_v63 = vpack.c.bf16 %v2166_v61, %v2160_v53  ;;  %v1866_v2 = vpack.c.bf16 %v2172_v5, %v2168_v62 }
  0x4f   :  { %v1858_v12 = vpack.c.bf16 %v848_v38, %v836_v44  ;;  %v1796_v36 = vpack.c.bf16 %v2179_v8, %v2176_v7  ;;  %v1868_v56 = vpack.c.bf16 %v2185_v11, %v2183_v10  ;;  %v1870_v57 = vpack.c.bf16 %v2204_v35, %v2202_v34 }
  0x50   :  { %1787 = vmatpush1.bf16.msra.mxu0 %v1786_v58  ;;  %v1884_v37 = vpack.c.bf16 %v792_v27, %v780_v22  ;;  %v2817_v44 = vand.u32 4294901760, %v2137_v28  ;;  %v2818_v17 = vand.u32 4294901760, %v2143_v40  ;;  %v2819_v18 = vand.u32 4294901760, %v2145_v41 }
  0x51   :  { %1859 = vmatpush1.bf16.msra.mxu1 %v1858_v12  ;;  %1789 = vmatprep.subr.bf16.mxu0 %v1788_v43  ;;  %v2820_v19 = vand.u32 4294901760, %v2147_v42  ;;  %v2821_v24 = vand.u32 4294901760, %v2151_v47  ;;  %v2822_v22 = vand.u32 4294901760, %v2155_v49  ;;  %v2823_v26 = vand.u32 4294901760, %v2158_v51 }
  0x52   :  { %1861 = vmatprep.subr.bf16.mxu1 %v1860_v13  ;;  %v1814_v38 = vpack.c.bf16 %v2817_v44, %v191_v45  ;;  %v2824_v40 = vand.u32 4294901760, %v2166_v61  ;;  %v2825_v42 = vand.u32 4294901760, %v2168_v62  ;;  %v2826_v47 = vand.u32 4294901760, %v2172_v5 }
  0x53   :  { %309 = vmatmul.mubr.f32.vlgmr.msra.gmra.mrb[0].mxu0 %v2222_v54  ;;  %v1888_v28 = vpack.c.bf16 %v2823_v26, %v2822_v22  ;;  %v2827_v51 = vand.u32 4294901760, %v2176_v7  ;;  %v2828_v27 = vand.u32 4294901760, %v2179_v8  ;;  %v2830_v53 = vand.u32 4294901760, %v2185_v11 }
  0x54   :  { %1791 = vmatpush1.bf16.msra.mxu0 %v1790_v55  ;;  %904 = vmatmul.mubr.f32.vlgmr.msra.gmra.mrb[0].mxu1 %v2222_v54  ;;  %v1798_v55 = vpack.c.bf16 %v2198_v32, %v2196_v31  ;;  %v1818_v41 = vpack.c.bf16 %v2824_v40, %v215_v15  ;;  %v1890_v49 = vpack.c.bf16 %v2826_v47, %v2825_v42  ;;  %v2831_v61 = vand.u32 4294901760, %v2196_v31 }
  0x55   :  { %1863 = vmatpush1.bf16.msra.mxu1 %v1862_v59  ;;  %1793 = vmatprep.subr.bf16.mxu0 %v1792_v50  ;;  %v1820_v45 = vpack.c.bf16 %v2828_v27, %v2827_v51  ;;  %v2832_v5 = vand.u32 4294901760, %v2202_v34  ;;  %v2057_v47 = vmov 2102212464   ;;  %v2058_v51 = vmov 920167782  }
  0x56   :  { %1865 = vmatprep.subr.bf16.mxu1 %v1864_v52  ;;  %403 = vmatprep.mubr.f32.mxu0 %v2053_v0  ;;  %v1822_v62 = vpack.c.bf16 %v251_v14, %v2831_v61 }
  0x57   :  { %998 = vmatprep.mubr.f32.mxu1 %v2053_v0  ;;  %v1894_v7 = vpack.c.bf16 %v846_v3, %v2832_v5 }
  0x58   :  { %1795 = vmatpush1.bf16.msra.mxu0 %v1794_v63 }
  0x59   :  { %1867 = vmatpush1.bf16.msra.mxu1 %v1866_v2  ;;  %1797 = vmatprep.subr.bf16.mxu0 %v1796_v36 }
  0x5a   :  { %1869 = vmatprep.subr.bf16.mxu1 %v1868_v56 }
  0x5c   :  { %1799 = vmatpush1.bf16.msra.mxu0 %v1798_v55 }
  0x5d   :  { %1871 = vmatpush1.bf16.msra.mxu1 %v1870_v57  ;;  %1801 = vmatprep.subr.bf16.mxu0 %v2120_v16 }
  0x5e   :  { %1873 = vmatprep.subr.bf16.mxu1 %v2128_v23 }
  0x5f   :  { %406 = vmatmul.mubr.f32.vlgmr.msra.gmra.mrb[0].mxu0 %v2230_v1 }
  0x60   :  { %1803 = vmatpush1.bf16.msra.mxu0 %v2132_v25  ;;  %1001 = vmatmul.mubr.f32.vlgmr.msra.gmra.mrb[0].mxu1 %v2230_v1  ;;  %v1812_v1 = vpack.c.bf16 %v197_v21, %v185_v20  ;;  %v1886_v20 = vpack.c.bf16 %v2819_v18, %v2818_v17  ;;  %v1816_v21 = vpack.c.bf16 %v2821_v24, %v2820_v19  ;;  %v2054_v24 = vmov 683565275  }
  0x61   :  { %1875 = vmatpush1.bf16.msra.mxu1 %v2141_v39  ;;  %1805 = vmatprep.subr.bf16.mxu0 %v2149_v46 }
  0x62   :  { %1877 = vmatprep.subr.bf16.mxu1 %v2153_v48  ;;  %488 = vmatprep.mubr.f32.mxu0 %v2053_v0 }
  0x63   :  { %1083 = vmatprep.mubr.f32.mxu1 %v2053_v0 }
  0x64   :  { %1807 = vmatpush1.bf16.msra.mxu0 %v2164_v60 }
  0x65   :  { %1879 = vmatpush1.bf16.msra.mxu1 %v2170_v4  ;;  %1809 = vmatprep.subr.bf16.mxu0 %v2174_v6 }
  0x66   :  { %1881 = vmatprep.subr.bf16.mxu1 %v2181_v9 }
  0x68   :  { %1811 = vmatpush1.bf16.msra.mxu0 %v2194_v30 }
  0x69   :  { %1883 = vmatpush1.bf16.msra.mxu1 %v2200_v33  ;;  %1813 = vmatprep.subr.bf16.mxu0 %v1812_v1 }
  0x6a   :  { %1885 = vmatprep.subr.bf16.mxu1 %v1884_v37 }
  0x6b   :  { %492 = vmatmul.mubr.f32.vlgmr.msra.gmra.mrb[0].mxu0 %v2241_v29 }
  0x6c   :  { %1815 = vmatpush1.bf16.msra.mxu0 %v1814_v38  ;;  %1087 = vmatmul.mubr.f32.vlgmr.msra.gmra.mrb[0].mxu1 %v2241_v29  ;;  %v2829_v29 = vand.u32 4294901760, %v2183_v10 }
  0x6d   :  { %1887 = vmatpush1.bf16.msra.mxu1 %v1886_v20  ;;  %1817 = vmatprep.subr.bf16.mxu0 %v1816_v21 }
  0x6e   :  { %1889 = vmatprep.subr.bf16.mxu1 %v1888_v28  ;;  %v1892_v43 = vpack.c.bf16 %v2830_v53, %v2829_v29  ;;  %598 = vmatprep.mubr.f32.mxu0 %v2053_v0  ;;  %v2055_v28 = vmov 2475754826  }
  0x6f   :  { %1193 = vmatprep.mubr.f32.mxu1 %v2053_v0 }
  0x70   :  { %1819 = vmatpush1.bf16.msra.mxu0 %v1818_v41  ;;  %v2056_v41 = vmov 2131351028  }
  0x71   :  { %1891 = vmatpush1.bf16.msra.mxu1 %v1890_v49  ;;  %1821 = vmatprep.subr.bf16.mxu0 %v1820_v45 }
  0x72   :  { %1893 = vmatprep.subr.bf16.mxu1 %v1892_v43 }
  0x74   :  { %1823 = vmatpush1.bf16.msra.mxu0 %v1822_v62  ;;  %v2059_v62 = vmov 1326507024  }
  0x75   :  { %1895 = vmatpush1.bf16.msra.mxu1 %v1894_v7  ;;  %1825 = vmatprep.subr.bf16.mxu0 %v2120_v16  ;;  %v71_v16 = vlaneseq }
  0x76   :  { %1897 = vmatprep.subr.bf16.mxu1 %v2128_v23 }
  0x77   :  { %600 = vmatmul.mubr.f32.vlgmr.msra.gmra.mrb[0].mxu0 %v2222_v54  ;;  %v2427_v23 = vshrl.u32 %v71_v16, 7 }
  0x78   :  { %1827 = vmatpush1.bf16.msra.mxu0 %v2132_v25  ;;  %1195 = vmatmul.mubr.f32.vlgmr.msra.gmra.mrb[0].mxu1 %v2222_v54  ;;  %v69_v25 = vld [vmem:[%s2798_s2] sm:$0xf] }
  0x79   :  { %1899 = vmatpush1.bf16.msra.mxu1 %v2141_v39  ;;  %1829 = vmatprep.subr.bf16.mxu0 %v2149_v46  ;;  %v81_v39 = vsub.s32 2, %v2427_v23  ;;  %v77_v46 = vsub.s32 1, %v2427_v23  ;;  %v85_v52 = vsub.s32 3, %v2427_v23 }
  0x7a   :  { %1901 = vmatprep.subr.bf16.mxu1 %v2153_v48  ;;  %682 = vmatprep.mubr.f32.mxu0 %v2053_v0 }
  0x7b   :  { %1277 = vmatprep.mubr.f32.mxu1 %v2053_v0  ;;  %v73_v0 = vsub.s32 0, %v2427_v23  ;;  %v2461_v44 = vrot.slane %v69_v25, %v85_v52 }
  0x7c   :  { %1831 = vmatpush1.bf16.msra.mxu0 %v2164_v60  ;;  %v82_v60 = vrot.slane %v69_v25, %v81_v39 }
  0x7d   :  { %1903 = vmatpush1.bf16.msra.mxu1 %v2170_v4  ;;  %1833 = vmatprep.subr.bf16.mxu0 %v2174_v6  ;;  %v74_v48 = vrot.slane %v69_v25, %v73_v0  ;;  %v78_v4 = vrot.slane %v69_v25, %v77_v46 }
  0x7e   :  { %1905 = vmatprep.subr.bf16.mxu1 %v2181_v9 }
  0x80   :  { %1835 = vmatpush1.bf16.msra.mxu0 %v2194_v30 }
  0x81   :  { %1907 = vmatpush1.bf16.msra.mxu1 %v2200_v33 }
  0x83   :  { %684 = vmatmul.mubr.f32.vlgmr.msra.gmra.mrb[0].mxu0 %v2222_v54 }
  0x84   :  { %1279 = vmatmul.mubr.f32.vlgmr.msra.gmra.mrb[0].mxu1 %v2222_v54 }
 0x156   :  { %v685_v6 = vpop.f32.mrb[0].mxu0 }
 0x157   :  { %v2441_v8 = vadd.f32 %v685_v6, %v74_v48  ;;  %v1280_v9 = vpop.f32.mrb[0].mxu1  ;;  %v687_v10 = vpop.f32.mrb[1].mxu0 }
 0x158   :  { %v2443_v11 = vadd.f32 %v1280_v9, %v82_v60  ;;  %v2445_v30 = vadd.f32 %v687_v10, %v78_v4  ;;  %v2447_v31 = vpop.f32.mrb[1].mxu1 }
 0x159   :  { %v1287_v32 = vand.u32 2147483647, %v2441_v8  ;;  %v1290_v33 = vand.u32 2139095040, %v2441_v8  ;;  %vm1289_vm15 = vcmp.lt.s32.totalorder %v2441_v8, 0 }
 0x15a   :  { %v1495_v34 = vand.u32 2147483647, %v2443_v11  ;;  %v1498_v35 = vand.u32 2139095040, %v2443_v11  ;;  %v1394_v58 = vand.u32 2139095040, %v2445_v30  ;;  %v1391_v18 = vand.u32 2147483647, %v2445_v30 }
 0x15b   :  { %v1291_v54 = vshrl.u32 %v1290_v33, 23  ;;  %v1294_v15 = vand.u32 8388607, %v1287_v32 }
 0x15c   :  { %v1499_v14 = vshrl.u32 %v1498_v35, 23  ;;  %v1502_v3 = vand.u32 8388607, %v1495_v34  ;;  %v1395_v59 = vshrl.u32 %v1394_v58, 23 }
 0x15d   :  { %v1748_v13 = vadd.s32 4294967169, %v1291_v54  ;;  %v1295_v63 = vor.u32 8388608, %v1294_v15 }
 0x15e   :  { %v1756_v12 = vadd.s32 4294967169, %v1499_v14  ;;  %v1503_v2 = vor.u32 8388608, %v1502_v3  ;;  %v1752_v56 = vadd.s32 4294967169, %v1395_v59 }
 0x15f   :  { %v1297_v50 = vadd.s32 1, %v1748_v13  ;;  %v2463_v38 = vshll.u32 %v1295_v63, 8 }
 0x160   :  { %v1505_v36 = vadd.s32 1, %v1756_v12  ;;  %v2465_v17 = vshll.u32 %v1503_v2, 8  ;;  %v2468_v20 = vadd.s32 1, %v1752_v56 }
 0x161   :  { %vm1298_vm1 = vcmp.gt.s32.totalorder %v1297_v50, 0 }
 0x162   :  { %v1299_v55 = vsel %vm1298_vm1, %v1297_v50, 0  ;;  %vm1506_vm2 = vcmp.gt.s32.totalorder %v1505_v36, 0  ;;  %vm1402_vm7 = vcmp.gt.s32.totalorder %v2468_v20, 0  ;;  %vm2585_vm1 = vcmp.le.f32.partialorder %v1287_v32, 0.7853982 }
 0x163   :  { %v1300_v57 = vshrl.u32 %v1299_v55, 5  ;;  %v1301_v1 = vand.u32 31, %v1299_v55  ;;  %v1507_v37 = vsel %vm1506_vm2, %v1505_v36, 0 }
 0x164   :  { %v2471_v22 = vshrl.u32 %v1507_v37, 5  ;;  %v1509_v26 = vand.u32 31, %v1507_v37 }
 0x165   :  { %v1302_v19 = vsub.s32 32, %v1301_v1  ;;  %v1304_v21 = vshll.u32 %v2054_v24, %v1301_v1  ;;  %v1307_v40 = vshll.u32 %v2055_v28, %v1301_v1  ;;  %v1310_v42 = vshll.u32 %v2056_v41, %v1301_v1 }
 0x166   :  { %v1313_v49 = vshll.u32 %v2057_v47, %v1301_v1  ;;  %v1316_v27 = vshll.u32 %v2058_v51, %v1301_v1  ;;  %vm1319_vm3 = vcmp.lt.s32.totalorder %v1300_v57, 1  ;;  %vm1320_vm4 = vcmp.lt.s32.totalorder %v1300_v57, 2 }
 0x167   :  { %v1305_v45 = vshrl.u32 %v2055_v28, %v1302_v19  ;;  %v1308_v29 = vshrl.u32 %v2056_v41, %v1302_v19  ;;  %v1311_v53 = vshrl.u32 %v2057_v47, %v1302_v19  ;;  %v1303_v43 = vshrl.u32 %v2054_v24, %v1302_v19 }
 0x168   :  { %v1314_v61 = vshrl.u32 %v2058_v51, %v1302_v19  ;;  %v1317_v5 = vshrl.u32 %v2059_v62, %v1302_v19  ;;  %v1510_v48 = vsub.s32 32, %v1509_v26  ;;  %vm1321_vm5 = vcmp.lt.s32.totalorder %v1300_v57, 3 }
 0x169   :  { %v1306_v7 = vor.u32 %v1305_v45, %v1304_v21  ;;  %v1309_v16 = vor.u32 %v1308_v29, %v1307_v40  ;;  %v1312_v25 = vor.u32 %v1311_v53, %v1310_v42  ;;  %vm1322_vm6 = vcmp.lt.s32.totalorder %v1300_v57, 4 }
 0x16a   :  { %v1315_v60 = vor.u32 %v1314_v61, %v1313_v49  ;;  %v1318_v4 = vor.u32 %v1317_v5, %v1316_v27  ;;  %v1512_v14 = vshll.u32 %v2054_v24, %v1509_v26  ;;  %v1513_v13 = vshrl.u32 %v2055_v28, %v1510_v48 }
 0x16b   :  { %v1323_v6 = vsel %vm1319_vm3, %v1303_v43, %v1306_v7  ;;  %v1324_v9 = vsel %vm1322_vm6, %v1312_v25, 2102212464  ;;  %v1327_v10 = vsel %vm1319_vm3, %v1306_v7, %v1309_v16  ;;  %v1331_v33 = vsel %vm1319_vm3, %v1309_v16, %v1312_v25 }
 0x16c   :  { %v1325_v35 = vsel %vm1321_vm5, %v1309_v16, %v1324_v9  ;;  %v1328_v54 = vsel %vm1322_vm6, %v1315_v60, 920167782  ;;  %v1332_v15 = vsel %vm1322_vm6, %v1318_v4, 1326507024  ;;  %v1515_v12 = vshll.u32 %v2055_v28, %v1509_v26 }
 0x16d   :  { %v1329_v3 = vsel %vm1321_vm5, %v1312_v25, %v1328_v54  ;;  %v1333_v58 = vsel %vm1321_vm5, %v1315_v60, %v1332_v15  ;;  %v1326_v59 = vsel %vm1320_vm4, %v1323_v6, %v1325_v35  ;;  %v1516_v2 = vshrl.u32 %v2056_v41, %v1510_v48  ;;  %v1285_v54 = vld [vmem:[%s2799_s3] sm:$0xf]  ;;  %s2061_s3 = smov [#allocation7]  }
 0x16e   :  { %v1330_v50 = vsel %vm1320_vm4, %v1327_v10, %v1329_v3  ;;  %v1334_v63 = vsel %vm1320_vm4, %v1331_v33, %v1333_v58  ;;  %v1514_v37 = vor.u32 %v1513_v13, %v1512_v14  ;;  %v1518_v21 = vshll.u32 %v2056_v41, %v1509_v26  ;;  %s1738_s16 = sshll.u32 %s2061_s3, 4  ;;  %s1739_s16 = int_to_ptr.vmem [resolvable:$true] %s1738_s16 }
 0x16f   :  { %v2495_v36 = vmul.u32.u64.low %v2463_v38, %v1334_v63  ;;  %v2496_v56 = vmul.u32.u64.high %v2463_v38, %v1334_v63, %v2495_v36  ;;  %v2499_v55 = vmul.u32.u64.low %v2463_v38, %v1330_v50  ;;  %v2500_v1 = vmul.u32.u64.high %v2463_v38, %v1330_v50, %v2499_v55  ;;  %s2021_s17 = scalar_lea.vmem %s1739_s16, 512  ;;  %p2026_p3 = scmp.lt.s32.totalorder %s1739_s16, %s1739_s16 }
 0x170   :  { %v1517_v19 = vor.u32 %v1516_v2, %v1515_v12  ;;  %v1519_v40 = vshrl.u32 %v2057_v47, %v1510_v48  ;;  %v1511_v57 = vshrl.u32 %v2054_v24, %v1510_v48  ;;  %v1521_v42 = vshll.u32 %v2057_v47, %v1509_v26  ;;  %p2022_p2 = scmp.ne.s32.totalorder %s1739_s16, %s2021_s17  ;;  %p2027_p4 = scmp.lt.s32.totalorder %s2021_s17, %s2021_s17 }
 0x171   :  { %v1522_v49 = vshrl.u32 %v2058_v51, %v1510_v48  ;;  %v1525_v27 = vshrl.u32 %v2059_v62, %v1510_v48  ;;  %v1342_v45 = vmul.u32 %v2463_v38, %v1326_v59  ;;  %v1524_v53 = vshll.u32 %v2058_v51, %v1509_v26 }
 0x172   :  { %v1520_v29 = vor.u32 %v1519_v40, %v1518_v21  ;;  %vm1527_vm8 = vcmp.lt.s32.totalorder %v2471_v22, 1  ;;  %vm1344_vm9 = vc.u32 %v2496_v56, %v2499_v55  ;;  %v1345_v43 = vadd.s32 1, %v2500_v1  ;;  %p2028_p5 = por %p2027_p4, %p2026_p3 }
 0x173   :  { %v1523_v61 = vor.u32 %v1522_v49, %v1521_v42  ;;  %vm1528_vm10 = vcmp.lt.s32.totalorder %v2471_v22, 2  ;;  %v1526_v5 = vor.u32 %v1525_v27, %v1524_v53  ;;  %vm1529_vm11 = vcmp.lt.s32.totalorder %v2471_v22, 3 }
 0x174   :  { %vm1530_vm12 = vcmp.lt.s32.totalorder %v2471_v22, 4  ;;  %v1535_v7 = vsel %vm1527_vm8, %v1514_v37, %v1517_v19  ;;  %v1346_v38 = vsel %vm1344_vm9, %v1345_v43, %v2500_v1  ;;  %v1539_v25 = vsel %vm1527_vm8, %v1517_v19, %v1520_v29  ;;  %p2029_p6 = pnand %p2028_p5, %p2022_p2 }
 0x175   :  { %v1532_v16 = vsel %vm1530_vm12, %v1520_v29, 2102212464  ;;  %v1536_v26 = vsel %vm1530_vm12, %v1523_v61, 920167782  ;;  %v1347_v48 = vadd.s32 %v1346_v38, %v1342_v45  ;;  %v1531_v60 = vsel %vm1527_vm8, %v1511_v57, %v1514_v37 }
 0x176   :  { %v1537_v4 = vsel %vm1529_vm11, %v1520_v29, %v1536_v26  ;;  %v1540_v6 = vsel %vm1530_vm12, %v1526_v5, 1326507024  ;;  %v1533_v9 = vsel %vm1529_vm11, %v1517_v19, %v1532_v16  ;;  %v1403_v35 = vsel %vm1402_vm7, %v2468_v20, 0 }
 0x177   :  { %v1538_v10 = vsel %vm1528_vm10, %v1535_v7, %v1537_v4  ;;  %v1541_v33 = vsel %vm1529_vm11, %v1523_v61, %v1540_v6  ;;  %v1348_v15 = vadd.s32 536870912, %v1347_v48  ;;  %v2540_v20 = vadd.f32 %v2447_v31, %v2461_v44 }
 0x178   :  { %v1542_v14 = vsel %vm1528_vm10, %v1539_v25, %v1541_v33  ;;  %v2530_v3 = vmul.u32.u64.low %v2465_v17, %v1538_v10  ;;  %v2531_v58 = vmul.u32.u64.high %v2465_v17, %v1538_v10, %v2530_v3  ;;  %v1534_v50 = vsel %vm1528_vm10, %v1531_v60, %v1533_v9 }
 0x179   :  { %v2535_v13 = vmul.u32.u64.low %v2465_v17, %v1542_v14  ;;  %v2536_v12 = vmul.u32.u64.high %v2465_v17, %v1542_v14, %v2535_v13  ;;  %v2542_v59 = vshrl.u32 %v1348_v15, 30  ;;  %v1405_v63 = vand.u32 31, %v1403_v35 }
 0x17a   :  { %vm1286_vm13 = vcmp.ne.f32.partialorder %v1285_v54, 0.0  ;;  %v1553_v36 = vadd.s32 1, %v2531_v58  ;;  %v1398_v1 = vand.u32 8388607, %v1391_v18  ;;  %v1550_v19 = vmul.u32 %v2465_v17, %v1534_v50 }
 0x17b   :  { %v1350_v2 = vshll.u32 %v2542_v59, 30  ;;  %v1406_v37 = vsub.s32 32, %v1405_v63  ;;  %vm1552_vm14 = vc.u32 %v2536_v12, %v2530_v3  ;;  %v1602_v31 = vand.u32 2139095040, %v2540_v20 }
 0x17c   :  { %v1554_v22 = vsel %vm1552_vm14, %v1553_v36, %v2531_v58  ;;  %v2060_v21 = vmov 0   ;;  %v1599_v49 = vand.u32 2147483647, %v2540_v20  ;;  %v1399_v17 = vor.u32 8388608, %v1398_v1 }
 0x17d   :  { %v2554_v44 = vsub.s32 %v1347_v48, %v1350_v2  ;;  %v2557_v40 = vsel %vm1286_vm13, 1, %v2060_v21  ;;  %v1555_v57 = vadd.s32 %v1554_v22, %v1550_v19  ;;  %v1409_v42 = vshrl.u32 %v2055_v28, %v1406_v37 }
 0x17e   :  { %v1412_v45 = vshrl.u32 %v2056_v41, %v1406_v37  ;;  %v1415_v29 = vshrl.u32 %v2057_v47, %v1406_v37  ;;  %v2564_v43 = vshrl.u32 %v1403_v35, 5  ;;  %v1408_v61 = vshll.u32 %v2054_v24, %v1405_v63 }
 0x17f   :  { %v1353_v27 = vsub.s32 0, %v2554_v44  ;;  %v1556_v53 = vadd.s32 536870912, %v1555_v57  ;;  %v1603_v5 = vshrl.u32 %v1602_v31, 23  ;;  %v1411_v38 = vshll.u32 %v2055_v28, %v1405_v63 }
 0x180   :  { %v1414_v16 = vshll.u32 %v2056_v41, %v1405_v63  ;;  %v1418_v26 = vshrl.u32 %v2058_v51, %v1406_v37  ;;  %v1410_v48 = vor.u32 %v1409_v42, %v1408_v61  ;;  %v1417_v60 = vshll.u32 %v2057_v47, %v1405_v63 }
 0x181   :  { %v1749_v7 = vmin.u32 %v1353_v27, %v2554_v44  ;;  %v2571_v25 = vshrl.u32 %v1556_v53, 30  ;;  %v1421_v4 = vshrl.u32 %v2059_v62, %v1406_v37  ;;  %v1413_v9 = vor.u32 %v1412_v45, %v1411_v38 }
 0x182   :  { %v1416_v10 = vor.u32 %v1415_v29, %v1414_v16  ;;  %v1420_v33 = vshll.u32 %v2058_v51, %v1405_v63  ;;  %v1343_v35 = vadd.s32 %v2499_v55, %v2496_v56  ;;  %v1419_v15 = vor.u32 %v1418_v26, %v1417_v60 }
 0x183   :  { %v1355_v6 = vclz %v1749_v7  ;;  %v1558_v54 = vshll.u32 %v2571_v25, 30  ;;  %v2580_v14 = vshll.u32 %v1399_v17, 8  ;;  %vm1426_vm0 = vcmp.lt.s32.totalorder %v2564_v43, 4 }
 0x184   :  { %v1422_v13 = vor.u32 %v1421_v4, %v1420_v33  ;;  %v1760_v50 = vadd.s32 4294967169, %v1603_v5  ;;  %vm1423_vm2 = vcmp.lt.s32.totalorder %v2564_v43, 1  ;;  %vm1425_vm3 = vcmp.lt.s32.totalorder %v2564_v43, 3 }
 0x185   :  { %v1750_v58 = vadd.s32 4294967294, %v1355_v6  ;;  %v2589_v63 = vsub.s32 %v1555_v57, %v1558_v54  ;;  %v1432_v56 = vsel %vm1426_vm0, %v1419_v15, 920167782  ;;  %vm1424_vm5 = vcmp.lt.s32.totalorder %v2564_v43, 2 }
 0x186   :  { %v1431_v55 = vsel %vm1423_vm2, %v1410_v48, %v1413_v9  ;;  %v1433_v32 = vsel %vm1425_vm3, %v1416_v10, %v1432_v56  ;;  %v1373_v1 = vsub.s32 4, %v2542_v59  ;;  %v1435_v31 = vsel %vm1423_vm2, %v1413_v9, %v1416_v10 }
 0x187   :  { %vm1751_vm4 = vcmp.lt.s32.totalorder %v1750_v58, 0  ;;  %v1561_v19 = vsub.s32 0, %v2589_v63  ;;  %v1428_v57 = vsel %vm1426_vm0, %v1416_v10, 2102212464  ;;  %v1436_v42 = vsel %vm1426_vm0, %v1422_v13, 1326507024 }
 0x188   :  { %v1358_v36 = vsel %vm1751_vm4, 0, %v1750_v58  ;;  %v1407_v17 = vshrl.u32 %v2054_v24, %v1406_v37  ;;  %v1434_v45 = vsel %vm1424_vm5, %v1431_v55, %v1433_v32  ;;  %v1437_v29 = vsel %vm1425_vm3, %v1419_v15, %v1436_v42 }
 0x189   :  { %v1359_v22 = vsub.s32 32, %v1358_v36  ;;  %v1363_v21 = vsub.s32 4294967266, %v1358_v36  ;;  %v1757_v27 = vmin.u32 %v1561_v19, %v2589_v63  ;;  %v1360_v53 = vshll.u32 %v2554_v44, %v1358_v36 }
 0x18a   :  { %v1438_v7 = vsel %vm1424_vm5, %v1435_v31, %v1437_v29  ;;  %v1374_v38 = vsel %vm1289_vm15, %v1373_v1, %v2542_v59  ;;  %v1427_v37 = vsel %vm1423_vm2, %v1407_v17, %v1410_v48  ;;  %v1429_v26 = vsel %vm1425_vm3, %v1413_v9, %v1428_v57 }
 0x18b   :  { %v1361_v61 = vshrl.u32 %v1343_v35, %v1359_v22  ;;  %v1364_v5 = vadd.s32 127, %v1363_v21  ;;  %v1563_v16 = vclz %v1757_v27  ;;  %v1609_v59 = vadd.s32 1, %v1760_v50 }
 0x18c   :  { %v2625_v44 = vmul.u32.u64.low %v2580_v14, %v1438_v7  ;;  %v2626_v6 = vmul.u32.u64.high %v2580_v14, %v1438_v7, %v2625_v44  ;;  %v2629_v33 = vmul.u32.u64.low %v2580_v14, %v1434_v45  ;;  %v2630_v35 = vmul.u32.u64.high %v2580_v14, %v1434_v45, %v2629_v33 }
 0x18d   :  { %v1362_v60 = vor.u32 %v1361_v61, %v1360_v53  ;;  %v1365_v4 = vshll.u32 %v1364_v5, 23  ;;  %v1758_v10 = vadd.s32 4294967294, %v1563_v16  ;;  %v1376_v48 = vsel %vm2585_vm1, 0, %v1374_v38 }
 0x18e   :  { %vm1497_vm6 = vcmp.lt.s32.totalorder %v2443_v11, 0  ;;  %v2638_v9 = vand.u32 8388607, %v1599_v49  ;;  %v1581_v15 = vsub.s32 4, %v2571_v25  ;;  %v1430_v58 = vsel %vm1424_vm5, %v1427_v37, %v1429_v26 }
 0x18f   :  { %v1366_v54 = vor.u32 4788187, %v1365_v4  ;;  %vm1759_vm7 = vcmp.lt.s32.totalorder %v1758_v10, 0  ;;  %vm1610_vm8 = vcmp.gt.s32.totalorder %v1609_v59, 0  ;;  %v1369_v56 = vcvt.s32.f32 %v1362_v60 }
 0x190   :  { %v1566_v50 = vsel %vm1759_vm7, 0, %v1758_v10  ;;  %vm1448_vm9 = vc.u32 %v2626_v6, %v2629_v33  ;;  %v1551_v55 = vadd.s32 %v2530_v3, %v2536_v12  ;;  %v1449_v1 = vadd.s32 1, %v2630_v35 }
 0x191   :  { %v1367_v13 = vand.u32 2147483647, %v1366_v54  ;;  %v1567_v32 = vsub.s32 32, %v1566_v50  ;;  %v1571_v36 = vsub.s32 4294967266, %v1566_v50  ;;  %v1380_v31 = vadd.s32 3, %v1376_v48 }
 0x192   :  { %v1446_v22 = vmul.u32 %v2580_v14, %v1430_v58  ;;  %v1611_v43 = vsel %vm1610_vm8, %v1609_v59, 0  ;;  %v1568_v21 = vshll.u32 %v2589_v63, %v1566_v50  ;;  %v1450_v27 = vsel %vm1448_vm9, %v1449_v1, %v2630_v35 }
 0x193   :  { %v1370_v19 = vmul.f32 %v1369_v56, %v1367_v13  ;;  %v1569_v57 = vshrl.u32 %v1551_v55, %v1567_v32  ;;  %v1572_v42 = vadd.s32 127, %v1571_v36  ;;  %v1582_v3 = vsel %vm1497_vm6, %v1581_v15, %v2571_v25 }
 0x194   :  { %v1451_v12 = vadd.s32 %v1450_v27, %v1446_v22  ;;  %v1613_v45 = vand.u32 31, %v1611_v43  ;;  %v2657_v29 = vrot.slane %v2557_v40, %v73_v0  ;;  %vm2661_vm10 = vcmp.le.f32.partialorder %v1495_v34, 0.7853982 }
 0x195   :  { %v1371_v17 = vxor.u32 2147483648, %v1370_v19  ;;  %v1570_v63 = vor.u32 %v1569_v57, %v1568_v21  ;;  %v1573_v53 = vshll.u32 %v1572_v42, 23  ;;  %v2667_v5 = vand.u32 3, %v1380_v31 }
 0x196   :  { %v1452_v25 = vadd.s32 536870912, %v1451_v12  ;;  %v1614_v7 = vsub.s32 32, %v1613_v45  ;;  %v1584_v34 = vsel %vm2661_vm10, 0, %v1582_v3  ;;  %v1607_v16 = vor.u32 8388608, %v2638_v9 }
 0x197   :  { %v1372_v61 = vsel %vm1289_vm15, %v1371_v17, %v1370_v19  ;;  %v1574_v38 = vor.u32 4788187, %v1573_v53  ;;  %v2677_v26 = vshrl.u32 %v1611_v43, 5  ;;  %v1577_v44 = vcvt.s32.f32 %v1570_v63 }
 0x198   :  { %v1375_v0 = vsel %vm2585_vm1, %v2441_v8, %v1372_v61  ;;  %v2675_v37 = vshrl.u32 %v1452_v25, 30  ;;  %v1617_v60 = vshrl.u32 %v2055_v28, %v1614_v7  ;;  %v1620_v10 = vshrl.u32 %v2056_v41, %v1614_v7 }
 0x199   :  { %1961 = vcosq.f32 %v1375_v0  ;;  %v1575_v4 = vand.u32 2147483647, %v1574_v38  ;;  %v1616_v35 = vshll.u32 %v2054_v24, %v1613_v45  ;;  %v1622_v59 = vshll.u32 %v2056_v41, %v1613_v45 }
 0x19a   :  { %1963 = vsinq.f32 %v1375_v0  ;;  %v1454_v2 = vshll.u32 %v2675_v37, 30  ;;  %v1623_v54 = vshrl.u32 %v2057_v47, %v1614_v7  ;;  %v1619_v9 = vshll.u32 %v2055_v28, %v1613_v45 }
 0x19b   :  { %v1578_v48 = vmul.f32 %v1577_v44, %v1575_v4  ;;  %v1625_v15 = vshll.u32 %v2057_v47, %v1613_v45  ;;  %v1626_v58 = vshrl.u32 %v2058_v51, %v1614_v7  ;;  %vm1386_vm11 = vcmp.eq.s32.totalorder %v2667_v5, 2 }
 0x19c   :  { %v2689_v13 = vsub.s32 %v1451_v12, %v1454_v2  ;;  %v1618_v56 = vor.u32 %v1617_v60, %v1616_v35  ;;  %v1624_v50 = vor.u32 %v1623_v54, %v1622_v59  ;;  %vm1383_vm12 = vcmp.eq.s32.totalorder %v2667_v5, 0 }
 0x19d   :  { %v1579_v55 = vxor.u32 2147483648, %v1578_v48  ;;  %v1621_v32 = vor.u32 %v1620_v10, %v1619_v9  ;;  %v1627_v41 = vor.u32 %v1626_v58, %v1625_v15  ;;  %v1629_v36 = vshrl.u32 %v2059_v62, %v1614_v7 }
 0x19e   :  { %vm1382_vm13 = vcmp.lt.s32.totalorder %v2667_v5, 2  ;;  %vm1720_vm14 = vcmp.eq.s32.totalorder %v2657_v29, 1  ;;  %v1588_v28 = vadd.s32 3, %v1584_v34  ;;  %v1457_v47 = vsub.s32 0, %v2689_v13 }
 0x19f   :  { %v1628_v1 = vshll.u32 %v2058_v51, %v1613_v45  ;;  %v2697_v19 = vshll.u32 %v1607_v16, 8  ;;  %vm1379_vm15 = vweird.f32 %v2441_v8  ;;  %v1580_v31 = vsel %vm1497_vm6, %v1579_v55, %v1578_v48 }
 0x1a0   :  { %v1615_v22 = vshrl.u32 %v2054_v24, %v1614_v7  ;;  %vm1631_vm0 = vcmp.lt.s32.totalorder %v2677_v26, 1  ;;  %vm1634_vm1 = vcmp.lt.s32.totalorder %v2677_v26, 4  ;;  %v1583_v62 = vsel %vm2661_vm10, %v2443_v11, %v1580_v31 }
 0x1a1   :  { %v1753_v43 = vmin.u32 %v1457_v47, %v2689_v13  ;;  %v1630_v51 = vor.u32 %v1629_v36, %v1628_v1  ;;  %v1636_v21 = vsel %vm1634_vm1, %v1624_v50, 2102212464  ;;  %1965 = vcosq.f32 %v1583_v62 }
 0x1a2   :  { %vm1632_vm2 = vcmp.lt.s32.totalorder %v2677_v26, 2  ;;  %v1639_v24 = vsel %vm1631_vm0, %v1618_v56, %v1621_v32  ;;  %v1640_v57 = vsel %vm1634_vm1, %v1627_v41, 920167782  ;;  %1967 = vsinq.f32 %v1583_v62 }
 0x1a3   :  { %v1962_v42 = vpop.eup %1961  ;;  %v1459_v27 = vclz %v1753_v43  ;;  %vm1633_vm3 = vcmp.lt.s32.totalorder %v2677_v26, 3  ;;  %v1635_v17 = vsel %vm1631_vm0, %v1615_v22, %v1618_v56  ;;  %v1643_v63 = vsel %vm1631_vm0, %v1621_v32, %v1624_v50 }
 0x1a4   :  { %v1964_v3 = vpop.eup %1963  ;;  %v1387_v12 = vxor.u32 2147483648, %v1962_v42  ;;  %v1637_v45 = vsel %vm1633_vm3, %v1621_v32, %v1636_v21  ;;  %v1641_v14 = vsel %vm1633_vm3, %v1624_v50, %v1640_v57  ;;  %v1644_v7 = vsel %vm1634_vm1, %v1630_v51, 1326507024 }
 0x1a5   :  { %v1384_v53 = vxor.u32 2147483648, %v1964_v3  ;;  %v1754_v61 = vadd.s32 4294967294, %v1459_v27  ;;  %v1642_v25 = vsel %vm1632_vm2, %v1639_v24, %v1641_v14  ;;  %v1645_v38 = vsel %vm1633_vm3, %v1627_v41, %v1644_v7 }
 0x1a6   :  { %v1388_v0 = vsel %vm1386_vm11, %v1387_v12, %v1964_v3  ;;  %v2728_v34 = vmul.u32.u64.low %v2697_v19, %v1642_v25  ;;  %v2729_v16 = vmul.u32.u64.high %v2697_v19, %v1642_v25, %v2728_v34  ;;  %v1447_v4 = vadd.s32 %v2629_v33, %v2626_v6 }
 0x1a7   :  { %v1385_v60 = vsel %vm1383_vm12, %v1962_v42, %v1384_v53  ;;  %vm1755_vm4 = vcmp.lt.s32.totalorder %v1754_v61, 0  ;;  %v1646_v44 = vsel %vm1632_vm2, %v1643_v63, %v1645_v38  ;;  %v1638_v6 = vsel %vm1632_vm2, %v1635_v17, %v1637_v45 }
 0x1a8   :  { %v1389_v10 = vsel %vm1382_vm13, %v1385_v60, %v1388_v0  ;;  %v1462_v2 = vsel %vm1755_vm4, 0, %v1754_v61  ;;  %v2741_v35 = vmul.u32.u64.low %v2697_v19, %v1646_v44  ;;  %v2742_v59 = vmul.u32.u64.high %v2697_v19, %v1646_v44, %v2741_v35 }
 0x1a9   :  { %v1390_v54 = vsel %vm1379_vm15, nan, %v1389_v10  ;;  %v1463_v48 = vsub.s32 32, %v1462_v2  ;;  %v1467_v9 = vsub.s32 4294967266, %v1462_v2  ;;  %v1589_v15 = vand.u32 3, %v1588_v28 }
 0x1aa   :  { %v1724_v33 = vsel %vm1720_vm14, %v1390_v54, %v2441_v8  ;;  %v1657_v5 = vadd.s32 1, %v2729_v16  ;;  %v1464_v58 = vshll.u32 %v2689_v13, %v1462_v2  ;;  %v1715_v32 = vrot.slane %v2557_v40, %v81_v39 }
 0x1ab   :  { %1728 = vst [vmem:[#allocation7] sm:$0xff] %v1724_v33  ;;  %v1465_v56 = vshrl.u32 %v1447_v4, %v1463_v48  ;;  %v1468_v50 = vadd.s32 127, %v1467_v9  ;;  %v1966_v55 = vpop.eup %1965  ;;  %v1654_v26 = vmul.u32 %v2697_v19, %v1638_v6  ;;  %vm1656_vm5 = vc.u32 %v2742_v59, %v2728_v34 }
 0x1ac   :  { %v1968_v29 = vpop.eup %1967  ;;  %v1595_v8 = vxor.u32 2147483648, %v1966_v55  ;;  %v1658_v28 = vsel %vm1656_vm5, %v1657_v5, %v2729_v16  ;;  %vm1594_vm6 = vcmp.eq.s32.totalorder %v1589_v15, 2  ;;  %vm1591_vm7 = vcmp.eq.s32.totalorder %v1589_v15, 0 }
 0x1ad   :  { %v1466_v41 = vor.u32 %v1465_v56, %v1464_v58  ;;  %v1469_v36 = vshll.u32 %v1468_v50, 23  ;;  %v1592_v47 = vxor.u32 2147483648, %v1968_v29  ;;  %v1659_v13 = vadd.s32 %v1658_v28, %v1654_v26 }
 0x1ae   :  { %v1596_v1 = vsel %vm1594_vm6, %v1595_v8, %v1968_v29  ;;  %vm1590_vm8 = vcmp.lt.s32.totalorder %v1589_v15, 2  ;;  %vm1722_vm9 = vcmp.eq.s32.totalorder %v1715_v32, 1  ;;  %vm1587_vm10 = vweird.f32 %v2443_v11 }
 0x1af   :  { %v1470_v31 = vor.u32 4788187, %v1469_v36  ;;  %v1593_v22 = vsel %vm1591_vm7, %v1966_v55, %v1592_v47  ;;  %v1660_v39 = vadd.s32 536870912, %v1659_v13  ;;  %v1473_v43 = vcvt.s32.f32 %v1466_v41 }
 0x1b0   :  { %v1597_v19 = vsel %vm1590_vm8, %v1593_v22, %v1596_v1  ;;  %v1477_v42 = vsub.s32 4, %v2675_v37  ;;  %vm1393_vm11 = vcmp.lt.s32.totalorder %v2445_v30, 0  ;;  %vm1392_vm12 = vcmp.le.f32.partialorder %v1391_v18, 0.7853982 }
 0x1b1   :  { %v1471_v62 = vand.u32 2147483647, %v1470_v31  ;;  %v1598_v51 = vsel %vm1587_vm10, nan, %v1597_v19  ;;  %v1661_v21 = vshrl.u32 %v1660_v39, 30  ;;  %v1655_v16 = vadd.s32 %v2728_v34, %v2742_v59 }
 0x1b2   :  { %v1726_v24 = vsel %vm1722_vm9, %v1598_v51, %v2443_v11  ;;  %v1478_v45 = vsel %vm1393_vm11, %v1477_v42, %v2675_v37  ;;  %v1711_v37 = vrot.slane %v2557_v40, %v77_v46  ;;  %vm1483_vm2 = vweird.f32 %v2445_v30 }
 0x1b3   :  { %v1474_v57 = vmul.f32 %v1473_v43, %v1471_v62  ;;  %1730 = vst [vmem:[#allocation7 + $0x10] sm:$0xff] %v1726_v24  ;;  %v1662_v27 = vshll.u32 %v1661_v21, 30  ;;  %v1480_v11 = vsel %vm1392_vm12, 0, %v1478_v45  ;;  %v1685_v55 = vsub.s32 4, %v1661_v21 }
 0x1b4   :  { %v1484_v25 = vadd.s32 3, %v1480_v11  ;;  %vm1721_vm1 = vcmp.eq.s32.totalorder %v1711_v37, 1  ;;  %vm1601_vm3 = vcmp.lt.s32.totalorder %v2540_v20, 0  ;;  %vm1600_vm4 = vcmp.le.f32.partialorder %v1599_v49, 0.7853982 }
 0x1b5   :  { %v1475_v17 = vxor.u32 2147483648, %v1474_v57  ;;  %v1663_v3 = vsub.s32 %v1659_v13, %v1662_v27  ;;  %v1686_v29 = vsel %vm1601_vm3, %v1685_v55, %v1661_v21  ;;  %v1719_v47 = vrot.slane %v2557_v40, %v85_v52 }
 0x1b6   :  { %v1485_v0 = vand.u32 3, %v1484_v25  ;;  %v1688_v41 = vsel %vm1600_vm4, 0, %v1686_v29  ;;  %vm1691_vm9 = vweird.f32 %v2540_v20 }
 0x1b7   :  { %v1476_v12 = vsel %vm1393_vm11, %v1475_v17, %v1474_v57  ;;  %v1665_v63 = vsub.s32 0, %v1663_v3  ;;  %v1692_v36 = vadd.s32 3, %v1688_v41  ;;  %vm1723_vm8 = vcmp.eq.s32.totalorder %v1719_v47, 1 }
 0x1b8   :  { %v1479_v14 = vsel %vm1392_vm12, %v2445_v30, %v1476_v12  ;;  %vm1490_vm14 = vcmp.eq.s32.totalorder %v1485_v0, 2  ;;  %vm1487_vm15 = vcmp.eq.s32.totalorder %v1485_v0, 0  ;;  %vm1486_vm0 = vcmp.lt.s32.totalorder %v1485_v0, 2 }
 0x1b9   :  { %1969 = vcosq.f32 %v1479_v14  ;;  %v1761_v53 = vmin.u32 %v1665_v63, %v1663_v3 }
 0x1ba   :  { %1971 = vsinq.f32 %v1479_v14 }
 0x1bb   :  { %v1667_v61 = vclz %v1761_v53 }
 0x1bd   :  { %v1762_v7 = vadd.s32 4294967294, %v1667_v61 }
 0x1bf   :  { %vm1763_vm13 = vcmp.lt.s32.totalorder %v1762_v7, 0 }
 0x1c0   :  { %v1670_v38 = vsel %vm1763_vm13, 0, %v1762_v7 }
 0x1c1   :  { %v1671_v18 = vsub.s32 32, %v1670_v38  ;;  %v1675_v60 = vsub.s32 4294967266, %v1670_v38  ;;  %v1672_v2 = vshll.u32 %v1663_v3, %v1670_v38 }
 0x1c3   :  { %v1970_v4 = vpop.eup %1969  ;;  %v1673_v35 = vshrl.u32 %v1655_v16, %v1671_v18  ;;  %v1676_v54 = vadd.s32 127, %v1675_v60 }
 0x1c4   :  { %v1972_v44 = vpop.eup %1971  ;;  %v1491_v10 = vxor.u32 2147483648, %v1970_v4 }
 0x1c5   :  { %v1488_v48 = vxor.u32 2147483648, %v1972_v44  ;;  %v1674_v6 = vor.u32 %v1673_v35, %v1672_v2  ;;  %v1677_v33 = vshll.u32 %v1676_v54, 23 }
 0x1c6   :  { %v1492_v9 = vsel %vm1490_vm14, %v1491_v10, %v1972_v44 }
 0x1c7   :  { %v1489_v34 = vsel %vm1487_vm15, %v1970_v4, %v1488_v48  ;;  %v1678_v15 = vor.u32 4788187, %v1677_v33  ;;  %v1681_v56 = vcvt.s32.f32 %v1674_v6 }
 0x1c8   :  { %v1493_v59 = vsel %vm1486_vm0, %v1489_v34, %v1492_v9 }
 0x1c9   :  { %v1494_v5 = vsel %vm1483_vm2, nan, %v1493_v59  ;;  %v1679_v58 = vand.u32 2147483647, %v1678_v15 }
 0x1ca   :  { %v1725_v46 = vsel %vm1721_vm1, %v1494_v5, %v2445_v30  ;;  %v1693_v30 = vand.u32 3, %v1692_v36 }
 0x1cb   :  { %1729 = vst [vmem:[#allocation7 + $0x8] sm:$0xff] %v1725_v46  ;;  %v1682_v50 = vmul.f32 %v1681_v56, %v1679_v58 }
 0x1cc   :  { %vm1698_vm5 = vcmp.eq.s32.totalorder %v1693_v30, 2  ;;  %vm1695_vm6 = vcmp.eq.s32.totalorder %v1693_v30, 0  ;;  %vm1694_vm7 = vcmp.lt.s32.totalorder %v1693_v30, 2 }
 0x1cd   :  { %v1683_v32 = vxor.u32 2147483648, %v1682_v50 }
 0x1cf   :  { %v1684_v26 = vsel %vm1601_vm3, %v1683_v32, %v1682_v50 }
 0x1d0   :  { %v1687_v8 = vsel %vm1600_vm4, %v2540_v20, %v1684_v26 }
 0x1d1   :  { %1973 = vcosq.f32 %v1687_v8 }
 0x1d2   :  { %1975 = vsinq.f32 %v1687_v8 }
 0x1db   :  { %v1974_v28 = vpop.eup %1973 }
 0x1dc   :  { %v1976_v13 = vpop.eup %1975  ;;  %v1699_v1 = vxor.u32 2147483648, %v1974_v28 }
 0x1dd   :  { %v1696_v31 = vxor.u32 2147483648, %v1976_v13 }
 0x1de   :  { %v1700_v49 = vsel %vm1698_vm5, %v1699_v1, %v1976_v13 }
 0x1df   :  { %v1697_v22 = vsel %vm1695_vm6, %v1974_v28, %v1696_v31 }
 0x1e0   :  { %v1701_v39 = vsel %vm1694_vm7, %v1697_v22, %v1700_v49 }
 0x1e1   :  { %v1702_v19 = vsel %vm1691_vm9, nan, %v1701_v39 }
 0x1e2   :  { %v1727_v23 = vsel %vm1723_vm8, %v1702_v19, %v2540_v20 }
 0x1e3   :  { %1731 = vst [vmem:[#allocation7 + $0x18] sm:$0xff] %v1727_v23 }
 0x1e4   :  { %2032 = shalt.err (!%p2029_p6)
}
 0x1e5   :  { %s2033_s20 = scalar_lea.hbm %s2800_s4, 512 }
 0x1e6   :  { %p2034_p7 = scmp.ne.s32.totalorder %s2800_s4, %s2033_s20  ;;  %p2037_p8 = scmp.lt.u32.totalorder %s2033_s20, %s2800_s4 }
 0x1e8   :  { %p2039_p9 = pnand %p2037_p8, %p2034_p7 }
 0x1ea   :  { %2042 = shalt.err (!%p2039_p9)
}
 0x1eb   :  { %1741 = dma.vmem_to_hbm [thread:$0]  %s1739_s16, 512, %s2800_s4, [#allocation4]  }
 0x1ec   :  { %2047 = dma.done.wait [#allocation4], 512  }
 0x1ed   :  { %2048 = vsyncadd [#allocation4], 4294966784 }
 0x1ee   :  { %1745 = vsyncpa [#allocation3], 1 }
 0x1ef   :  { %1746 = vsyncpa [#allocation6], 1 }
 0x1f0   :  { %1747 = vsyncpa [#allocation4], 1 }

</bundles_post_ra>
